<compile_context>
chip_gen: v7x
topology: tpu7x:2x2x1
jax: 0.10.0
libtpu: 0.0.40
codegen_flags: <defaults>
</compile_context>

<pallas_src>
import functools

import jax
import jax.numpy as jnp
from jax.experimental import pallas as pl
from jax.experimental.pallas import tpu as pltpu

_LANE = 128
_SUB = 8
_MIN_CHUNK = _LANE * _SUB     # 1024 elements
_TILE_ROWS = 8192             # (8192,128) f32 = 4 MiB/block (perf review: amortize step overhead)


def _simse_sum_kernel(pred_ref, real_ref, out_ref, acc_ref, *,
                      tile_rows, total_rows, needs_mask):
    i = pl.program_id(0)
    last = pl.num_programs(0) - 1

    @pl.when(i == 0)
    def _():
        acc_ref[...] = jnp.zeros_like(acc_ref)

    # hot path: elementwise diff in f32 vregs (VPU); cast happens in-kernel so
    # sub-32-bit inputs only pay their native HBM bytes.
    diff = real_ref[...].astype(jnp.float32) - pred_ref[...].astype(jnp.float32)

    def _fold(x):
        # fold (tile_rows, 128) -> (8, 128) with VPU-only adds (no cross-lane work)
        return jnp.sum(x.reshape(tile_rows // _SUB, _SUB, _LANE), axis=0)

    if needs_mask:
        # mask only on the last (ragged) tile; full tiles stay vld+sub+add only.
        @pl.when(i != last)
        def _():
            acc_ref[...] += _fold(diff)

        @pl.when(i == last)
        def _():
            row_ids = i * tile_rows + jax.lax.broadcasted_iota(
                jnp.int32, diff.shape, 0)
            acc_ref[...] += _fold(jnp.where(row_ids < total_rows, diff, 0.0))
    else:
        acc_ref[...] += _fold(diff)

    @pl.when(i == last)
    def _():
        # single XLU reduce, in the epilogue only
        out_ref[0, 0] = jnp.sum(acc_ref[...])


def simse(pred, real):
    assert pred.shape == real.shape
    n = pred.size
    inv_n = 1.0 / float(n)

    p_flat = pred.reshape(-1)
    r_flat = real.reshape(-1)

    main = (n // _MIN_CHUNK) * _MIN_CHUNK   # 1024-aligned prefix streamed by the kernel

    if main == 0:
        # tiny, unaligned input: nothing worth streaming through a kernel.
        total = jnp.sum(r_flat.astype(jnp.float32) - p_flat.astype(jnp.float32))
        return (total * inv_n) ** 2

    rows = main // _LANE                    # multiple of 8
    p2 = p_flat[:main].reshape(rows, _LANE)
    r2 = r_flat[:main].reshape(rows, _LANE)

    if rows <= _TILE_ROWS:
        tile_rows = rows                    # single block: no pipeline/grid overhead
        grid = (1,)
        needs_mask = False
    else:
        tile_rows = _TILE_ROWS
        grid = (pl.cdiv(rows, tile_rows),)
        needs_mask = (rows % tile_rows) != 0

    kernel = functools.partial(
        _simse_sum_kernel,
        tile_rows=tile_rows,
        total_rows=rows,
        needs_mask=needs_mask,
    )

    itemsize = pred.dtype.itemsize + real.dtype.itemsize

    s_main = pl.pallas_call(
        kernel,
        out_shape=jax.ShapeDtypeStruct((1, 1), jnp.float32),
        grid_spec=pltpu.PrefetchScalarGridSpec(
            num_scalar_prefetch=0,
            grid=grid,
            in_specs=[
                pl.BlockSpec((tile_rows, _LANE), lambda i: (i, 0)),
                pl.BlockSpec((tile_rows, _LANE), lambda i: (i, 0)),
            ],
            out_specs=pl.BlockSpec(memory_space=pltpu.SMEM),
            scratch_shapes=[pltpu.VMEM((_SUB, _LANE), jnp.float32)],
        ),
        compiler_params=pltpu.CompilerParams(
            dimension_semantics=("arbitrary",),
            vmem_limit_bytes=24 * 1024 * 1024,
        ),
        cost_estimate=pl.CostEstimate(
            flops=2 * main,
            transcendentals=0,
            bytes_accessed=main * itemsize,
        ),
    )(p2, r2)[0, 0]

    if main < n:
        # <1024-element remainder: cheap wrapper-side sum (no O(n) pad pass).
        tail = jnp.sum(r_flat[main:].astype(jnp.float32)
                       - p_flat[main:].astype(jnp.float32))
        total = s_main + tail
    else:
        total = s_main

    # scale before squaring (f32-safe), avoids the Python-int n**2 overflow.
    return (total * inv_n) ** 2


def simse_ref(pred, real):
    diffs = real.astype(jnp.float32) - pred.astype(jnp.float32)
    n = diffs.size
    return (jnp.sum(diffs) / float(n)) ** 2


if __name__ == "__main__":
    key = jax.random.PRNGKey(0)
    k1, k2, k3, k4, k5, k6 = jax.random.split(key, 6)

    # primary test: small NCHW feature maps (single-block fast path)
    pred = jax.random.normal(k1, (2, 4, 16, 16), dtype=jnp.float32)
    real = jax.random.normal(k2, (2, 4, 16, 16), dtype=jnp.float32)
    out = jax.block_until_ready(simse(pred, real))
    ref = simse_ref(pred, real)
    assert jnp.allclose(out, ref, rtol=1e-3, atol=1e-9), (out, ref)

    # tiled path with a ragged last tile: 1,105,920 elems -> 8640 rows ->
    # grid of 2 x 8192-row tiles, last tile masked in-kernel.
    pred2 = jax.random.normal(k3, (3, 6, 240, 256), dtype=jnp.float32)
    real2 = jax.random.normal(k4, (3, 6, 240, 256), dtype=jnp.float32)
    out2 = jax.block_until_ready(simse(pred2, real2))
    ref2 = simse_ref(pred2, real2)
    assert jnp.allclose(out2, ref2, rtol=1e-2, atol=1e-10), (out2, ref2)

    # numel not a multiple of 1024: kernel streams the aligned prefix, the
    # 128-element remainder is added wrapper-side.
    pred3 = jax.random.normal(k5, (2, 4, 16, 17), dtype=jnp.float32)
    real3 = jax.random.normal(k6, (2, 4, 16, 17), dtype=jnp.float32)
    out3 = jax.block_until_ready(simse(pred3, real3))
    ref3 = simse_ref(pred3, real3)
    assert jnp.allclose(out3, ref3, rtol=1e-3, atol=1e-9), (out3, ref3)

    print("KERNEL_OK")
</pallas_src>

<mosaic_0001>
module attributes {stable_mosaic.version = 11 : i64} {
  func.func @_simse_sum_kernel(%arg0: i32, %arg1: memref<16x128xf32, #tpu.memory_space<vmem>>, %arg2: memref<16x128xf32, #tpu.memory_space<vmem>>, %arg3: memref<1x1xf32, #tpu.memory_space<smem>>, %arg4: memref<8x128xf32, #tpu.memory_space<vmem>>) attributes {dimension_semantics = [#tpu.dimension_semantics<arbitrary>], iteration_bounds = array<i64: 1>, scalar_prefetch = 0 : i64, scratch_operands = 1 : i64, tpu.core_type = #tpu.core_type<tc>, window_params = [{transform_indices = @transform_0, window_bounds = array<i64: 16, 128>}, {transform_indices = @transform_1, window_bounds = array<i64: 16, 128>}, {transform_indices = @transform_2, window_bounds = array<i64: 1, 1>}]} {
    %c0_i32 = arith.constant 0 : i32
    %0 = arith.cmpi eq, %arg0, %c0_i32 : i32
    %1 = arith.extui %0 : i1 to i32
    %c0_i32_0 = arith.constant 0 : i32
    %2 = arith.cmpi ne, %1, %c0_i32_0 : i32
    scf.if %2 {
      %cst_10 = arith.constant 0.000000e+00 : f32
      %14 = vector.broadcast %cst_10 : f32 to vector<8x128xf32>
      %c0_11 = arith.constant 0 : index
      %c0_12 = arith.constant 0 : index
      %15 = vector.load %arg4[%c0_11, %c0_12] : memref<8x128xf32, #tpu.memory_space<vmem>>, vector<8x128xf32>
      tpu.vector_store %arg4[%c0_11, %c0_12], %14 {strides = array<i32>} : memref<8x128xf32, #tpu.memory_space<vmem>>, vector<8x128xf32>,
    } else {
    }
    %c0 = arith.constant 0 : index
    %c0_1 = arith.constant 0 : index
    %3 = vector.load %arg2[%c0, %c0_1] : memref<16x128xf32, #tpu.memory_space<vmem>>, vector<16x128xf32>
    %c0_2 = arith.constant 0 : index
    %c0_3 = arith.constant 0 : index
    %4 = vector.load %arg1[%c0_2, %c0_3] : memref<16x128xf32, #tpu.memory_space<vmem>>, vector<16x128xf32>
    %5 = arith.subf %3, %4 : vector<16x128xf32>
    %c0_4 = arith.constant 0 : index
    %c0_5 = arith.constant 0 : index
    %6 = vector.load %arg4[%c0_4, %c0_5] : memref<8x128xf32, #tpu.memory_space<vmem>>, vector<8x128xf32>
    %7 = vector.shape_cast %5 : vector<16x128xf32> to vector<2x8x128xf32>
    %cst = arith.constant dense<0.000000e+00> : vector<8x128xf32>
    %8 = vector.multi_reduction <add>, %7, %cst [0] : vector<2x8x128xf32> to vector<8x128xf32>
    %9 = arith.addf %6, %8 : vector<8x128xf32>
    %c0_6 = arith.constant 0 : index
    %c0_7 = arith.constant 0 : index
    %10 = vector.load %arg4[%c0_6, %c0_7] : memref<8x128xf32, #tpu.memory_space<vmem>>, vector<8x128xf32>
    tpu.vector_store %arg4[%c0_6, %c0_7], %9 {strides = array<i32>} : memref<8x128xf32, #tpu.memory_space<vmem>>, vector<8x128xf32>,
    %c0_i32_8 = arith.constant 0 : i32
    %11 = arith.cmpi eq, %arg0, %c0_i32_8 : i32
    %12 = arith.extui %11 : i1 to i32
    %c0_i32_9 = arith.constant 0 : i32
    %13 = arith.cmpi ne, %12, %c0_i32_9 : i32
    scf.if %13 {
      %c0_10 = arith.constant 0 : index
      %c0_11 = arith.constant 0 : index
      %14 = vector.load %arg4[%c0_10, %c0_11] : memref<8x128xf32, #tpu.memory_space<vmem>>, vector<8x128xf32>
      %15 = vector.shape_cast %14 : vector<8x128xf32> to vector<1x8x128xf32>
      %cst_12 = arith.constant dense<0.000000e+00> : vector<1xf32>
      %16 = vector.multi_reduction <add>, %15, %cst_12 [1, 2] : vector<1x8x128xf32> to vector<1xf32>
      %17 = vector.shape_cast %16 : vector<1xf32> to vector<1x1x1xf32>
      %18 = vector.extract %17[0, 0, 0] : f32 from vector<1x1x1xf32>
      %c0_13 = arith.constant 0 : index
      %c0_14 = arith.constant 0 : index
      %19 = memref.load %arg3[%c0_13, %c0_14] : memref<1x1xf32, #tpu.memory_space<smem>>
      memref.store %18, %arg3[%c0_13, %c0_14] : memref<1x1xf32, #tpu.memory_space<smem>>
    } else {
    }
    return
  }
  func.func @transform_0(%arg0: i32) -> (i32, i32) {
    %c0_i32 = arith.constant 0 : i32
    %c0_i32_0 = arith.constant 0 : i32
    return %arg0, %c0_i32 : i32, i32
  }
  func.func @transform_1(%arg0: i32) -> (i32, i32) {
    %c0_i32 = arith.constant 0 : i32
    %c0_i32_0 = arith.constant 0 : i32
    return %arg0, %c0_i32 : i32, i32
  }
  func.func @transform_2(%arg0: i32) -> (i32, i32) {
    %c0_i32 = arith.constant 0 : i32
    %c0_i32_0 = arith.constant 0 : i32
    %c0_i32_1 = arith.constant 0 : i32
    return %c0_i32, %c0_i32_0 : i32, i32
  }
}

</mosaic_0001>

<bundles_post_ra>
// kernel: tpu_custom_call.1
= control target key start
LH: loop header
LB: loop body
LE: loop exit
PB: predicated region body
PF: predicated region fallthrough
CT: control target
= control target key end

     0   :  { %7 = vsyncpa [#allocation4], 0  ;;  %s208_s0 = inlined_call_operand.hbm [shape: f32[16,128], index: 0, kind: input, shape index: {}]   ;;  %s209_s1 = inlined_call_operand.hbm [shape: f32[16,128], index: 1, kind: input, shape index: {}]   ;;  %s210_s2 = inlined_call_operand.hbm [shape: f32[1,1], index: 2, kind: output, shape index: {}]  }
   0x1   :  { %8 = vsyncpa [#allocation7], 0 }
   0x2   :  { %9 = vsyncpa [#allocation5], 0  ;;  %s152_s9 = smov [#allocation3]   ;;  %s92_s13 = scalar_lea.hbm %s208_s0, 256 }
   0x3   :  { %s15_s10 = sshll.u32 %s152_s9, 4  ;;  %p93_p0 = scmp.ne.s32.totalorder %s208_s0, %s92_s13  ;;  %s16_s10 = int_to_ptr.vmem [resolvable:$true] %s15_s10 }
   0x4   :  { %p96_p1 = scmp.lt.u32.totalorder %s92_s13, %s208_s0 }
   0x6   :  { %p98_p2 = pnand %p96_p1, %p93_p0 }
   0x8   :  { %101 = shalt.err (!%p98_p2)
}
   0x9   :  { %s102_s18 = scalar_lea.vmem %s16_s10, 256  ;;  %p107_p4 = scmp.lt.s32.totalorder %s16_s10, %s16_s10 }
   0xa   :  { %p103_p3 = scmp.ne.s32.totalorder %s16_s10, %s102_s18  ;;  %p108_p5 = scmp.lt.s32.totalorder %s102_s18, %s102_s18 }
   0xc   :  { %p109_p6 = por %p108_p5, %p107_p4 }
   0xe   :  { %p110_p7 = pnand %p109_p6, %p103_p3 }
  0x10   :  { %113 = shalt.err (!%p110_p7)
}
  0x11   :  { %s153_s19 = smov 128   ;;  %s154_s20 = smov 8  }
  0x12   :  { %21 = dma.hbm_to_vmem [thread:$0]  %s208_s0, 256, %s16_s10, [#allocation4], %s153_s19, %s153_s19, %s154_s20  }
  0x13   :  { %s155_s23 = smov [#allocation6]   ;;  %s114_s27 = scalar_lea.hbm %s209_s1, 256 }
  0x14   :  { %s27_s24 = sshll.u32 %s155_s23, 4  ;;  %p115_p8 = scmp.ne.s32.totalorder %s209_s1, %s114_s27  ;;  %s28_s24 = int_to_ptr.vmem [resolvable:$true] %s27_s24 }
  0x15   :  { %p118_p9 = scmp.lt.u32.totalorder %s114_s27, %s209_s1 }
  0x17   :  { %p120_p10 = pnand %p118_p9, %p115_p8 }
  0x19   :  { %123 = shalt.err (!%p120_p10)
}
  0x1a   :  { %s124_s4 = scalar_lea.vmem %s28_s24, 256  ;;  %p129_p12 = scmp.lt.s32.totalorder %s28_s24, %s28_s24 }
  0x1b   :  { %p125_p11 = scmp.ne.s32.totalorder %s28_s24, %s124_s4  ;;  %p130_p13 = scmp.lt.s32.totalorder %s124_s4, %s124_s4 }
  0x1d   :  { %p131_p0 = por %p130_p13, %p129_p12 }
  0x1f   :  { %p132_p1 = pnand %p131_p0, %p125_p11 }
  0x21   :  { %135 = shalt.err (!%p132_p1)
}
  0x22   :  { %33 = dma.hbm_to_vmem [thread:$0]  %s209_s1, 256, %s28_s24, [#allocation7], %s153_s19, %s153_s19, %s154_s20  }
  0x23   :  { %146 = dma.done.wait [#allocation4], 256  }
  0x24   :  { %147 = vsyncadd [#allocation4], 4294967040 }
  0x25   :  { %148 = dma.done.wait [#allocation7], 256  }
  0x26   :  { %149 = vsyncadd [#allocation7], 4294967040  ;;  %v45_v0 = vld [vmem:[#allocation6] sm:$0xff]  ;;  %v46_v1 = vld [vmem:[#allocation6 + $0x8] sm:$0xff]  ;;  %s136_s8 = scalar_lea.hbm %s210_s2, 16 }
  0x27   :  { %v47_v2 = vld [vmem:[#allocation3] sm:$0xff]  ;;  %v48_v3 = vld [vmem:[#allocation3 + $0x8] sm:$0xff]  ;;  %p137_p2 = scmp.ne.s32.totalorder %s210_s2, %s136_s8  ;;  %p140_p3 = scmp.lt.u32.totalorder %s136_s8, %s210_s2 }
  0x28   :  { %v49_v4 = vsub.f32 %v45_v0, %v47_v2  ;;  %v50_v5 = vsub.f32 %v46_v1, %v48_v3 }
  0x29   :  { %p142_p4 = pnand %p140_p3, %p137_p2 }
  0x2a   :  { %v52_v6 = vadd.f32 %v50_v5, %v49_v4 }
  0x2c   :  { %59 = vadd.xlane.f32.xlu0 %v52_v6 }
  0xb9   :  { %v60_v7 = vpop.xlane.xlu0 %59 }
  0xba   :  { %v61_v8 = vrot.slane %v60_v7, 4 }
  0xbc   :  { %v62_v9 = vadd.f32 %v61_v8, %v60_v7 }
  0xbe   :  { %v63_v10 = vrot.slane %v62_v9, 2 }
  0xc0   :  { %v64_v11 = vadd.f32 %v63_v10, %v62_v9 }
  0xc2   :  { %v65_v12 = vrot.slane %v64_v11, 1 }
  0xc4   :  { %v66_v13 = vadd.f32 %v65_v12, %v64_v11 }
  0xc6   :  { %85 = vpush %v66_v13 }
  0xf7   :  { %s86_s1 = spop %85 }
  0xf8   :  { %69 = sst [smem:[#allocation8]] %s86_s1 }
  0xf9   :  { %145 = shalt.err (!%p142_p4)
}
  0xfa   :  { %s156_s13 = smov [#allocation8]  }
  0xfb   :  { %77 = dma.smem_to_hbm %s156_s13, 16, %s210_s2, [#allocation5]  }
  0xfc   :  { %150 = dma.done.wait [#allocation5], 16  }
  0xfd   :  { %151 = vsyncadd [#allocation5], 4294967280 }
  0xfe   :  { %81 = sfence }
  0xff   :  { %82 = vsyncpa [#allocation4], 1 }
 0x100   :  { %83 = vsyncpa [#allocation7], 1 }
 0x101   :  { %84 = vsyncpa [#allocation5], 1 }

</bundles_post_ra>
